<compile_context>
chip_gen: v7x
topology: tpu7x:2x2x1
jax: 0.10.0
libtpu: 0.0.40
codegen_flags: <defaults>
</compile_context>

<pallas_src>
import jax
import jax.numpy as jnp
from jax import lax
from jax.experimental import pallas as pl
from jax.experimental.pallas import tpu as pltpu


def _baseline_kernel(node_ref, q_ref, mask_ref, out_ref):
    # node_ref: (TB, TN, D)   q_ref: (TB, D)   mask_ref: (TB, TN)   out_ref: (TB, TN)
    x = node_ref[...]                     # raw (un-normalized) dense node features
    q = q_ref[...]                        # raw question features
    m = mask_ref[...]                     # 1.0 for real nodes, 0.0 for padding

    # Single pass over x: un-normalized dot product and squared norms.
    xq = jnp.sum(x * q[:, None, :], axis=-1)              # (TB, TN)
    x_sq = jnp.sum(x * x, axis=-1)                         # (TB, TN)
    q_sq = jnp.sum(q * q, axis=-1, keepdims=True)          # (TB, 1)

    # Cosine similarity via rsqrt post-scaling (EUP slot).  Zero / padded rows have
    # xq == 0, so the clamped rsqrt keeps them at exactly 0 (mask re-zeroes anyway).
    inv_xn = lax.rsqrt(jnp.maximum(x_sq, 1e-24))           # (TB, TN)
    inv_qn = lax.rsqrt(jnp.maximum(q_sq, 1e-24))           # (TB, 1)

    out_ref[...] = xq * inv_xn * inv_qn * m


def _choose_tiling(B, N, D, *, itemsize=4, target_block_bytes=4 << 20, min_steps=8):
    """Pick (tile_b, tile_n) for the (B, N, D) node tensor.

    Legality (satisfies the (8,128) rule for every BlockSpec used below):
      * tile_b is a multiple of 8 OR equals B,
      * tile_n is a multiple of 128 OR equals N.
    Targets ~4 MiB node blocks, >= min_steps grid steps when the problem allows,
    and splits N when a minimal batch tile would still blow the VMEM budget.
    """
    row_bytes = max(N * D * itemsize, 1)

    # Batch tile from the byte target.
    tb = max(1, target_block_bytes // row_bytes)
    tb = min(tb, B)
    # Keep enough grid steps for pipelining / megacore when B alone can supply them.
    if B // max(tb, 1) < min_steps and B >= min_steps * 8:
        tb = B // min_steps
    # Legal alignment: whole batch, or a multiple of 8.
    if B <= 8 or tb >= B:
        tb = B
    else:
        tb = max(8, (tb // 8) * 8)
        if tb >= B:
            tb = B

    # Tile N as well when even the smallest legal batch tile is too big (VMEM),
    # or when there are too few grid steps and N can provide more.
    tn = N
    too_big = tb * row_bytes > 2 * target_block_bytes
    too_few = pl.cdiv(B, tb) < min_steps and N >= 2 * 128
    if (too_big or too_few) and N > 128:
        tb = B if B <= 8 else 8
        rows = target_block_bytes // max(tb * D * itemsize, 1)
        tn = min(N, max(128, (rows // 128) * 128))
    return tb, tn


def baseline_forward(dense_nodes, question_features, padding_mask, *,
                     tile_b=None, tile_n=None, target_block_bytes=4 << 20):
    """dense_nodes: (B, N, D), question_features: (B, D), padding_mask: (B, N).

    Returns logits of shape (B, N, 1), matching the PyTorch module.
    """
    B, N, D = dense_nodes.shape

    auto_tb, auto_tn = _choose_tiling(B, N, D, target_block_bytes=target_block_bytes)
    tb = auto_tb if tile_b is None else int(tile_b)
    tn = auto_tn if tile_n is None else int(tile_n)
    # (8,128) legality for the 2D mask / out blocks (the 3D node block only needs
    # its last two dims to equal the full array dims or be (8,128)-aligned, which
    # the choices below guarantee).
    assert tb == B or (tb % 8 == 0 and tb <= B), (tb, B)
    assert tn == N or (tn % 128 == 0 and tn <= N), (tn, N)

    grid = (pl.cdiv(B, tb), pl.cdiv(N, tn))

    x = dense_nodes if dense_nodes.dtype == jnp.float32 else dense_nodes.astype(jnp.float32)
    q = question_features if question_features.dtype == jnp.float32 else \
        question_features.astype(jnp.float32)
    m = padding_mask if padding_mask.dtype == jnp.float32 else \
        padding_mask.astype(jnp.float32)

    out = pl.pallas_call(
        _baseline_kernel,
        out_shape=jax.ShapeDtypeStruct((B, N), jnp.float32),
        grid_spec=pltpu.PrefetchScalarGridSpec(
            num_scalar_prefetch=0,
            grid=grid,
            in_specs=[
                pl.BlockSpec((tb, tn, D), lambda b, n: (b, n, 0)),   # nodes
                pl.BlockSpec((tb, D), lambda b, n: (b, 0)),          # question feats
                pl.BlockSpec((tb, tn), lambda b, n: (b, n)),         # mask
            ],
            out_specs=pl.BlockSpec((tb, tn), lambda b, n: (b, n)),
        ),
        compiler_params=pltpu.CompilerParams(
            dimension_semantics=("parallel", "parallel"),
            vmem_limit_bytes=32 * 1024 * 1024),
    )(x, q, m)

    # No padding was added, so this reshape is metadata-only.
    return out.reshape(B, N, 1)


def to_dense_batch(x, batch, batch_size, max_num_nodes):
    """JAX glue equivalent of torch_geometric.utils.to_dense_batch (sorted batch vector)."""
    n_total, d = x.shape
    counts = jnp.bincount(batch, length=batch_size)
    offsets = jnp.concatenate([jnp.zeros((1,), jnp.int32),
                               jnp.cumsum(counts)[:-1].astype(jnp.int32)])
    pos = jnp.arange(n_total, dtype=jnp.int32) - offsets[batch]
    dense = jnp.zeros((batch_size, max_num_nodes, d), x.dtype).at[batch, pos].set(x)
    mask = jnp.zeros((batch_size, max_num_nodes), jnp.float32).at[batch, pos].set(1.0)
    return dense, mask


def _reference(dense_nodes, question_features, padding_mask):
    # Pure-JAX reference (same math as the PyTorch forward).
    xn = dense_nodes / jnp.maximum(
        jnp.linalg.norm(dense_nodes, axis=-1, keepdims=True), 1e-12)
    qn = question_features / jnp.linalg.norm(question_features, axis=1, keepdims=True)
    ref = jnp.matmul(xn, qn[:, None, :].transpose(0, 2, 1)) * padding_mask[..., None]
    return ref


if __name__ == "__main__":
    key = jax.random.PRNGKey(0)
    k1, k2, k3, k4 = jax.random.split(key, 4)

    # ---------------- Test 1: module-sized example (B=2 graphs) ----------------
    B = 2              # num_graphs
    D = 32             # feature dim (CLIP uses 512; small here)
    MAX_NODES = 16     # max_num_nodes
    nodes_per_graph = (10, 14)
    n_total = sum(nodes_per_graph)

    # Raw (un-normalized) node features and PyG-style batch assignment vector.
    node_x = jax.random.normal(k1, (n_total, D), dtype=jnp.float32)
    batch_vec = jnp.concatenate([
        jnp.full((nodes_per_graph[0],), 0, jnp.int32),
        jnp.full((nodes_per_graph[1],), 1, jnp.int32),
    ])

    # Synthetic stand-in for CLIP text features (see TODO above).
    question_features = jax.random.normal(k2, (B, D), dtype=jnp.float32)

    dense_nodes, padding_mask = to_dense_batch(node_x, batch_vec, B, MAX_NODES)

    logits = baseline_forward(dense_nodes, question_features, padding_mask)
    logits = jax.block_until_ready(logits)

    ref = _reference(dense_nodes, question_features, padding_mask)
    assert logits.shape == (B, MAX_NODES, 1), logits.shape
    assert jnp.allclose(logits, ref, atol=1e-5), float(jnp.max(jnp.abs(logits - ref)))

    # ---------------- Test 2: exercise the no-pad partial-block path -----------
    B2, N2, D2 = 12, 200, 64
    x2 = jax.random.normal(k3, (B2, N2, D2), dtype=jnp.float32)
    q2 = jax.random.normal(k4, (B2, D2), dtype=jnp.float32)
    # Mark the last few node slots of each graph as padding (and zero them).
    m2 = (jnp.arange(N2)[None, :] < (N2 - 7)).astype(jnp.float32)
    m2 = jnp.broadcast_to(m2, (B2, N2))
    x2 = x2 * m2[..., None]

    out2 = baseline_forward(x2, q2, m2, tile_b=8, tile_n=128)   # grid (2, 2), partial tails
    out2 = jax.block_until_ready(out2)
    ref2 = _reference(x2, q2, m2)
    assert out2.shape == (B2, N2, 1), out2.shape
    assert jnp.allclose(out2, ref2, atol=1e-5), float(jnp.max(jnp.abs(out2 - ref2)))

    print("KERNEL_OK")
</pallas_src>

<mosaic_0001>
module attributes {stable_mosaic.version = 11 : i64} {
  func.func @_baseline_kernel(%arg0: i32, %arg1: i32, %arg2: memref<2x16x32xf32, #tpu.memory_space<vmem>>, %arg3: memref<2x32xf32, #tpu.memory_space<vmem>>, %arg4: memref<2x16xf32, #tpu.memory_space<vmem>>, %arg5: memref<2x16xf32, #tpu.memory_space<vmem>>) attributes {dimension_semantics = [#tpu.dimension_semantics<parallel>, #tpu.dimension_semantics<parallel>], iteration_bounds = array<i64: 1, 1>, scalar_prefetch = 0 : i64, scratch_operands = 0 : i64, tpu.core_type = #tpu.core_type<tc>, window_params = [{transform_indices = @transform_0, window_bounds = array<i64: 2, 16, 32>}, {transform_indices = @transform_1, window_bounds = array<i64: 2, 32>}, {transform_indices = @transform_2, window_bounds = array<i64: 2, 16>}, {transform_indices = @transform_3, window_bounds = array<i64: 2, 16>}]} {
    %c0 = arith.constant 0 : index
    %c0_0 = arith.constant 0 : index
    %c0_1 = arith.constant 0 : index
    %0 = vector.load %arg2[%c0, %c0_0, %c0_1] : memref<2x16x32xf32, #tpu.memory_space<vmem>>, vector<2x16x32xf32>
    %c0_2 = arith.constant 0 : index
    %c0_3 = arith.constant 0 : index
    %1 = vector.load %arg3[%c0_2, %c0_3] : memref<2x32xf32, #tpu.memory_space<vmem>>, vector<2x32xf32>
    %c0_4 = arith.constant 0 : index
    %c0_5 = arith.constant 0 : index
    %2 = vector.load %arg4[%c0_4, %c0_5] : memref<2x16xf32, #tpu.memory_space<vmem>>, vector<2x16xf32>
    %3 = vector.shape_cast %1 : vector<2x32xf32> to vector<2x1x32xf32>
    %4 = vector.broadcast %3 : vector<2x1x32xf32> to vector<2x16x32xf32>
    %5 = arith.mulf %0, %4 : vector<2x16x32xf32>
    %cst = arith.constant dense<0.000000e+00> : vector<2x16xf32>
    %6 = vector.multi_reduction <add>, %5, %cst [2] : vector<2x16x32xf32> to vector<2x16xf32>
    %7 = arith.mulf %0, %0 : vector<2x16x32xf32>
    %cst_6 = arith.constant dense<0.000000e+00> : vector<2x16xf32>
    %8 = vector.multi_reduction <add>, %7, %cst_6 [2] : vector<2x16x32xf32> to vector<2x16xf32>
    %9 = arith.mulf %1, %1 : vector<2x32xf32>
    %cst_7 = arith.constant dense<0.000000e+00> : vector<2xf32>
    %10 = vector.multi_reduction <add>, %9, %cst_7 [1] : vector<2x32xf32> to vector<2xf32>
    %11 = vector.shape_cast %10 : vector<2xf32> to vector<2x1xf32>
    %cst_8 = arith.constant 1.000000e-24 : f32
    %12 = vector.broadcast %cst_8 : f32 to vector<2x16xf32>
    %13 = arith.maximumf %8, %12 : vector<2x16xf32>
    %14 = math.rsqrt %13 : vector<2x16xf32>
    %cst_9 = arith.constant 1.000000e-24 : f32
    %15 = vector.broadcast %cst_9 : f32 to vector<2x1xf32>
    %16 = arith.maximumf %11, %15 : vector<2x1xf32>
    %17 = math.rsqrt %16 : vector<2x1xf32>
    %18 = arith.mulf %6, %14 : vector<2x16xf32>
    %19 = vector.broadcast %17 : vector<2x1xf32> to vector<2x16xf32>
    %20 = arith.mulf %18, %19 : vector<2x16xf32>
    %21 = arith.mulf %20, %2 : vector<2x16xf32>
    %c0_10 = arith.constant 0 : index
    %c0_11 = arith.constant 0 : index
    %22 = vector.load %arg5[%c0_10, %c0_11] : memref<2x16xf32, #tpu.memory_space<vmem>>, vector<2x16xf32>
    tpu.vector_store %arg5[%c0_10, %c0_11], %21 {strides = array<i32>} : memref<2x16xf32, #tpu.memory_space<vmem>>, vector<2x16xf32>,
    return
  }
  func.func @transform_0(%arg0: i32, %arg1: i32) -> (i32, i32, i32) {
    %c0_i32 = arith.constant 0 : i32
    %c0_i32_0 = arith.constant 0 : i32
    return %arg0, %arg1, %c0_i32 : i32, i32, i32
  }
  func.func @transform_1(%arg0: i32, %arg1: i32) -> (i32, i32) {
    %c0_i32 = arith.constant 0 : i32
    %c0_i32_0 = arith.constant 0 : i32
    return %arg0, %c0_i32 : i32, i32
  }
  func.func @transform_2(%arg0: i32, %arg1: i32) -> (i32, i32) {
    %c0_i32 = arith.constant 0 : i32
    return %arg0, %arg1 : i32, i32
  }
  func.func @transform_3(%arg0: i32, %arg1: i32) -> (i32, i32) {
    %c0_i32 = arith.constant 0 : i32
    return %arg0, %arg1 : i32, i32
  }
}

</mosaic_0001>

<bundles_post_ra>
// kernel: tpu_custom_call.1
= control target key start
LH: loop header
LB: loop body
LE: loop exit
PB: predicated region body
PF: predicated region fallthrough
CT: control target
= control target key end

     0   :  { %8 = vsyncpa [#allocation3], 0  ;;  %s369_s0 = inlined_call_operand.hbm [shape: f32[2,16,32], index: 0, kind: input, shape index: {}]   ;;  %s370_s1 = inlined_call_operand.vmem [shape: f32[2,32], index: 1, kind: input, shape index: {}]   ;;  %s371_s2 = inlined_call_operand.vmem [shape: f32[2,16], index: 2, kind: input, shape index: {}]   ;;  %s372_s3 = inlined_call_operand.hbm [shape: f32[2,16], index: 3, kind: output, shape index: {}]  }
   0x1   :  { %9 = vsyncpa [#allocation4], 0  ;;  %s290_s12 = smov [#allocation2]   ;;  %s242_s16 = scalar_lea.hbm %s369_s0, 512 }
   0x2   :  { %s15_s13 = sshll.u32 %s290_s12, 4  ;;  %p243_p0 = scmp.ne.s32.totalorder %s369_s0, %s242_s16  ;;  %s16_s13 = int_to_ptr.vmem [resolvable:$true] %s15_s13 }
   0x3   :  { %p246_p1 = scmp.lt.u32.totalorder %s242_s16, %s369_s0 }
   0x5   :  { %p248_p2 = pnand %p246_p1, %p243_p0 }
   0x7   :  { %251 = shalt.err (!%p248_p2)
}
   0x8   :  { %s252_s21 = scalar_lea.vmem %s16_s13, 512  ;;  %p257_p4 = scmp.lt.s32.totalorder %s16_s13, %s16_s13 }
   0x9   :  { %p253_p3 = scmp.ne.s32.totalorder %s16_s13, %s252_s21  ;;  %p258_p5 = scmp.lt.s32.totalorder %s252_s21, %s252_s21 }
   0xb   :  { %p259_p6 = por %p258_p5, %p257_p4 }
   0xd   :  { %p260_p7 = pnand %p259_p6, %p253_p3 }
   0xf   :  { %263 = shalt.err (!%p260_p7)
}
  0x10   :  { %s291_s22 = smov 128   ;;  %s292_s23 = smov 8  }
  0x11   :  { %21 = dma.hbm_to_vmem [thread:$0]  %s369_s0, 512, %s16_s13, [#allocation3], %s291_s22, %s291_s22, %s292_s23  }
  0x12   :  { %286 = dma.done.wait [#allocation3], 512  }
  0x13   :  { %287 = vsyncadd [#allocation3], 4294966784  ;;  %v39_v0 = vlaneseq  ;;  %v293_v1 = vmov 1966171168   ;;  %v29_v6 = vld [vmem:[#allocation2] sm:$0xff]  ;;  %vm72_vm0 = vcmask 261120  }
  0x14   :  { %v37_v2 = vunpack.c.l.s4 %v293_v1  ;;  %v31_v7 = vld [vmem:[#allocation2 + $0x10] sm:$0xff]  ;;  %v30_v8 = vld [vmem:[#allocation2 + $0x8] sm:$0xff]  ;;  %v85_v9 = vmul.f32 %v29_v6, %v29_v6  ;;  %v32_v12 = vld [vmem:[#allocation2 + $0x18] sm:$0xff]  ;;  %vm102_vm1 = vcmask 254976   ;;  %v294_v40 = vmov 0  }
  0x15   :  { %v329_v3 = vshrl.u32 %v39_v0, 7  ;;  %v87_v10 = vmul.f32 %v31_v7, %v31_v7  ;;  %v86_v11 = vmul.f32 %v30_v8, %v30_v8  ;;  %v33_v13 = vld [vmem:[%s370_s1] sm:$0x3]  ;;  %v88_v14 = vmul.f32 %v32_v12, %v32_v12  ;;  %231 = vset.pattern.permute.xlu0 %v294_v40  ;;  %230 = vset.pattern.permute.xlu1 %v294_v40 }
  0x16   :  { %v38_v4 = vunpack.c.0.s8 %v37_v2  ;;  %v89_v17 = vsel %vm72_vm0, %v85_v9, 0.0  ;;  %v101_v23 = vmul.f32 %v33_v13, %v33_v13  ;;  %v34_v36 = vld [vmem:[%s371_s2] sm:$0x3]  ;;  %vm193_vm2 = vcmask 130112   ;;  %s295_s2 = smov [#allocation5]  }
  0x17   :  { %v336_v16 = vsub.s32 0, %v329_v3  ;;  %v95_v18 = vsel %vm72_vm0, %v87_v10, 0.0  ;;  %90 = vadd.xlane.f32.xlu0 %v89_v17  ;;  %v92_v21 = vsel %vm72_vm0, %v86_v11, 0.0  ;;  %v98_v22 = vsel %vm72_vm0, %v88_v14, 0.0  ;;  %s215_s28 = sshll.u32 %s295_s2, 4  ;;  %s216_s28 = int_to_ptr.vmem [resolvable:$true] %s215_s28 }
  0x18   :  { %v41_v5 = vsub.s32 %v38_v4, %v329_v3  ;;  %96 = vadd.xlane.f32.xlu1 %v95_v18  ;;  %v103_v28 = vsel %vm102_vm1, %v101_v23, 0.0  ;;  %v127_v38 = vsub.s32 1, %v329_v3  ;;  %vm204_vm3 = vcmask 1041409   ;;  %s264_s29 = scalar_lea.vmem %s216_s28, 32  ;;  %p269_p9 = scmp.lt.s32.totalorder %s216_s28, %s216_s28 }
  0x19   :  { %v139_v37 = vrot.slane %v34_v36, %v336_v16  ;;  %vm207_vm4 = vcmask 123904   ;;  %p265_p8 = scmp.ne.s32.totalorder %s216_s28, %s264_s29  ;;  %p270_p10 = scmp.lt.s32.totalorder %s264_s29, %s264_s29 }
  0x1a   :  { %v42_v15 = vrot.slane %v33_v13, %v41_v5  ;;  %v150_v39 = vrot.slane %v34_v36, %v127_v38 }
  0x1b   :  { %93 = vadd.xlane.f32.xlu0 %v92_v21  ;;  %p271_p11 = por %p270_p10, %p269_p9 }
  0x1c   :  { %v43_v19 = vcombine.high %v42_v15, %v42_v15  ;;  %v50_v20 = vrot.slane %v42_v15, %v41_v5  ;;  %99 = vadd.xlane.f32.xlu1 %v98_v22 }
  0x1d   :  { %p272_p12 = pnand %p271_p11, %p265_p8 }
  0x1e   :  { %v61_v24 = vrot.slane %v50_v20, %v336_v16  ;;  %v57_v25 = vrot.slane %v43_v19, %v41_v5 }
  0x1f   :  { %104 = vadd.xlane.f32.xlu0 %v103_v28 }
  0x20   :  { %v68_v26 = vmul.f32 %v61_v24, %v29_v6  ;;  %v65_v27 = vrot.slane %v57_v25, %v336_v16  ;;  %v69_v29 = vmul.f32 %v61_v24, %v30_v8 }
  0x22   :  { %v73_v30 = vsel %vm72_vm0, %v68_v26, 0.0  ;;  %v70_v31 = vmul.f32 %v65_v27, %v31_v7  ;;  %v76_v33 = vsel %vm72_vm0, %v69_v29, 0.0  ;;  %v71_v34 = vmul.f32 %v65_v27, %v32_v12 }
  0x23   :  { %74 = vadd.xlane.f32.xlu1 %v73_v30  ;;  %77 = vadd.xlane.f32.xlu0 %v76_v33 }
  0x24   :  { %v79_v32 = vsel %vm72_vm0, %v70_v31, 0.0  ;;  %v82_v35 = vsel %vm72_vm0, %v71_v34, 0.0 }
  0x27   :  { %80 = vadd.xlane.f32.xlu1 %v79_v32  ;;  %83 = vadd.xlane.f32.xlu0 %v82_v35 }
  0x38   :  { %141 = vbcast.lane.b32.xlu1 %v139_v37, 256 }
  0x3c   :  { %152 = vbcast.lane.b32.xlu1 %v150_v39, 256 }
  0x3d   :  { %145 = vbcast.lane.b32.xlu0 %v139_v37, 264 }
  0x40   :  { %156 = vbcast.lane.b32.xlu1 %v150_v39, 264 }
  0xa4   :  { %v91_v41 = vpop.xlane.xlu0 %90 }
  0xa5   :  { %v97_v42 = vpop.xlane.xlu1 %96  ;;  %v106_v43 = vmax.f32 %v91_v41, 1e-24 }
  0xa6   :  { %v108_v44 = vmax.f32 %v97_v42, 1e-24 }
  0xa7   :  { %232 = vrsqrt.f32 %v106_v43 }
  0xa8   :  { %v94_v45 = vpop.xlane.xlu0 %93  ;;  %234 = vrsqrt.f32 %v108_v44 }
  0xa9   :  { %v100_v46 = vpop.xlane.xlu1 %99  ;;  %v107_v47 = vmax.f32 %v94_v45, 1e-24 }
  0xaa   :  { %v109_v50 = vmax.f32 %v100_v46, 1e-24 }
  0xab   :  { %236 = vrsqrt.f32 %v107_v47 }
  0xac   :  { %v105_v48 = vpop.xlane.xlu0 %104 }
  0xad   :  { %v114_v51 = vmax.f32 %v105_v48, 1e-24 }
  0xaf   :  { %238 = vrsqrt.f32 %v114_v51 }
  0xb0   :  { %v75_v49 = vpop.xlane.xlu1 %74  ;;  %v78_v52 = vpop.xlane.xlu0 %77  ;;  %240 = vrsqrt.f32 %v109_v50 }
  0xb1   :  { %v233_v54 = vpop.eup %232 }
  0xb2   :  { %v235_v56 = vpop.eup %234  ;;  %v116_v60 = vmul.f32 %v233_v54, %v75_v49 }
  0xb4   :  { %v81_v53 = vpop.xlane.xlu1 %80  ;;  %v84_v55 = vpop.xlane.xlu0 %83 }
  0xb5   :  { %v237_v57 = vpop.eup %236  ;;  %v118_v61 = vmul.f32 %v235_v56, %v81_v53 }
  0xb6   :  { %v117_v62 = vmul.f32 %v237_v57, %v78_v52 }
  0xb8   :  { %v142_v58 = vpop.permute.xlu1 %141  ;;  %v146_v4 = vpop.permute.xlu0 %145 }
  0xb9   :  { %v239_v59 = vpop.eup %238 }
  0xba   :  { %v124_v63 = vrot.slane %v239_v59, %v336_v16  ;;  %v128_v1 = vrot.slane %v239_v59, %v127_v38  ;;  %v241_v2 = vpop.eup %240  ;;  %v183_v16 = vand.u32 127, %v39_v0 }
  0xbb   :  { %v119_v9 = vmul.f32 %v241_v2, %v84_v55 }
  0xbc   :  { %v131_v5 = vmul.f32 %v124_v63, %v116_v60  ;;  %v132_v6 = vmul.f32 %v124_v63, %v117_v62  ;;  %v153_v7 = vpop.permute.xlu1 %152  ;;  %v133_v10 = vmul.f32 %v128_v1, %v118_v61  ;;  %v188_v17 = vadd.s32 4294967288, %v183_v16 }
  0xbd   :  { %v134_v13 = vmul.f32 %v128_v1, %v119_v9  ;;  %v186_v20 = vsub.s32 %v183_v16, %v329_v3 }
  0xbe   :  { %v162_v8 = vmul.f32 %v142_v58, %v131_v5  ;;  %v163_v11 = vmul.f32 %v146_v4, %v132_v6  ;;  %v164_v12 = vmul.f32 %v153_v7, %v133_v10  ;;  %v191_v19 = vsub.s32 %v188_v17, %v329_v3 }
  0xc0   :  { %174 = vperm.xlu0 %231, %v163_v11   ;;  %171 = vperm.xlu1 %230, %v162_v8   ;;  %v157_v14 = vpop.permute.xlu1 %156 }
  0xc1   :  { %v165_v15 = vmul.f32 %v157_v14, %v134_v13 }
  0xc4   :  { %177 = vperm.xlu1 %230, %v164_v12  }
  0xc8   :  { %180 = vperm.xlu1 %230, %v165_v15  }
 0x13f   :  { %v172_v18 = vpop.permute.xlu1 %171  ;;  %v175_v21 = vpop.permute.xlu0 %174 }
 0x140   :  { %v192_v23 = vrot.slane %v175_v21, %v191_v19  ;;  %v187_v24 = vrot.slane %v172_v18, %v186_v20 }
 0x142   :  { %v194_v28 = vsel %vm193_vm2, %v192_v23, %v187_v24 }
 0x143   :  { %v178_v22 = vpop.permute.xlu1 %177 }
 0x144   :  { %v198_v26 = vrot.slane %v178_v22, %v186_v20 }
 0x147   :  { %v181_v25 = vpop.permute.xlu1 %180 }
 0x148   :  { %v202_v27 = vrot.slane %v181_v25, %v191_v19 }
 0x14a   :  { %v203_v0 = vsel %vm193_vm2, %v202_v27, %v198_v26 }
 0x14b   :  { %v205_v29 = vsel %vm204_vm3, %v203_v0, %v194_v28 }
 0x14c   :  { %208 = vst.msk [vmem:[#allocation5] sm:$0x3] %vm207_vm4, %v205_v29 }
 0x14d   :  { %275 = shalt.err (!%p272_p12)
}
 0x14e   :  { %s276_s5 = scalar_lea.hbm %s372_s3, 32 }
 0x14f   :  { %p277_p13 = scmp.ne.s32.totalorder %s372_s3, %s276_s5  ;;  %p280_p0 = scmp.lt.u32.totalorder %s276_s5, %s372_s3 }
 0x151   :  { %p282_p1 = pnand %p280_p0, %p277_p13 }
 0x153   :  { %285 = shalt.err (!%p282_p1)
}
 0x154   :  { %218 = dma.vmem_to_hbm [thread:$0]  %s216_s28, 32, %s372_s3, [#allocation4]  }
 0x155   :  { %288 = dma.done.wait [#allocation4], 32  }
 0x156   :  { %289 = vsyncadd [#allocation4], 4294967264 }
 0x157   :  { %222 = vsyncpa [#allocation3], 1 }
 0x158   :  { %223 = vsyncpa [#allocation4], 1 }

</bundles_post_ra>
